<compile_context>
chip_gen: v7x
topology: tpu7x:2x2x1
jax: 0.10.0
libtpu: 0.0.40
codegen_flags: <defaults>
</compile_context>

<pallas_src>
import functools

import jax
import jax.numpy as jnp
from jax.experimental import pallas as pl
from jax.experimental.pallas import tpu as pltpu


_LANE = 128                     # TPU lane width
_SUBLANE_ALIGN = 32             # sublane multiple valid for f32 / bf16 / int8 blocks
_COL_CHUNK = 512                # in-kernel compute chunk (bounds f32 temporaries)
_MAX_ROW_TILE = 256             # keeps padded (tr, 1) scratch / output buffers small
_TARGET_STEP_BYTES = 6 << 20    # combined (attn + seg) HBM bytes per grid step
_VMEM_LIMIT_BYTES = 48 << 20    # <= v7x 64 MiB physical; ample headroom on v5e/v6e


def _choose_tiles(R, L, bytes_per_elem, block_rows=None, block_cols=None):
    """Dtype-aware (row, col) tile selection.

    Rows: multiple of 32 (safe for f32/bf16/int8) or the full dim; aims for
    >= 4 row tiles when R is large so the v7x megacore has work on both TCs.
    Cols: multiple of _COL_CHUNK (or the full dim), sized so the combined
    (attn + seg) block hits ~_TARGET_STEP_BYTES of HBM traffic per grid step.
    """
    if block_rows is not None:
        tr = min(block_rows, R)
        assert tr == R or tr % _SUBLANE_ALIGN == 0, "block_rows must be mult of 32 or >= R"
    elif R <= 64:
        tr = R                               # too few rows to split profitably
    else:
        tr = -(-R // 4)                      # aim for >= 4 row tiles (v7x megacore)
        tr = ((tr + _SUBLANE_ALIGN - 1) // _SUBLANE_ALIGN) * _SUBLANE_ALIGN
        tr = min(tr, _MAX_ROW_TILE)

    if block_cols is not None:
        tl = min(block_cols, L)
        assert tl == L or tl % _LANE == 0, "block_cols must be mult of 128 or >= L"
    else:
        target_cols = max(_COL_CHUNK, _TARGET_STEP_BYTES // max(1, tr * bytes_per_elem))
        if L <= target_cols:
            tl = L                           # whole reduction axis in one block
        else:
            tl = (target_cols // _COL_CHUNK) * _COL_CHUNK
    return tr, tl


def _balanced_l1_kernel(attn_ref, seg_ref, out_ref,
                        asum_sc, ssum_sc, aobj_sc, amax_sc,
                        *, normalize: bool, n_cols: int):
    tl = attn_ref.shape[-1]
    mask_cols = (n_cols % tl) != 0            # static: ragged last L block needs masking
    li = pl.program_id(1)
    n_l = pl.num_programs(1)
    col_base = li * tl                        # global column offset of this block

    @pl.when(li == 0)
    def _init():
        asum_sc[...] = jnp.zeros_like(asum_sc)
        ssum_sc[...] = jnp.zeros_like(ssum_sc)
        aobj_sc[...] = jnp.zeros_like(aobj_sc)
        if normalize:
            amax_sc[...] = jnp.full_like(amax_sc, -jnp.inf)

    def accumulate(off, width):
        # Chunked reduce: f32 working set is bounded by (tr, width), not (tr, tl).
        a = attn_ref[:, pl.ds(off, width)].astype(jnp.float32)
        s = seg_ref[:, pl.ds(off, width)].astype(jnp.float32)
        if mask_cols:
            gcol = col_base + off + jax.lax.broadcasted_iota(jnp.int32, a.shape, 1)
            valid = gcol < n_cols
            a_for_max = jnp.where(valid, a, -jnp.inf) if normalize else a
            a = jnp.where(valid, a, 0.0)
            s = jnp.where(valid, s, 0.0)
        else:
            a_for_max = a
        asum_sc[...] += jnp.sum(a, axis=-1, keepdims=True)
        ssum_sc[...] += jnp.sum(s, axis=-1, keepdims=True)
        aobj_sc[...] += jnp.sum(a * s, axis=-1, keepdims=True)
        if normalize:
            amax_sc[...] = jnp.maximum(
                amax_sc[...], jnp.max(a_for_max, axis=-1, keepdims=True))

    n_full = tl // _COL_CHUNK
    tail = tl % _COL_CHUNK
    if n_full == 1:
        accumulate(0, _COL_CHUNK)
    elif n_full > 1:
        @pl.loop(0, n_full)
        def _chunks(c):
            accumulate(pl.multiple_of(c * _COL_CHUNK, _COL_CHUNK), _COL_CHUNK)
    if tail:
        accumulate(n_full * _COL_CHUNK, tail)

    @pl.when(li == n_l - 1)
    def _finalize():
        attn_sum = asum_sc[...]
        attn_obj = aobj_sc[...]
        seg_sum = ssum_sc[...]
        if normalize:
            # Reference: attn /= (max(attn, axis=2) + 1e-5); fold the scale into
            # the reduced sums.  Exact divide on a tiny (tr, 1) vector is free.
            inv_max = 1.0 / (amax_sc[...] + 1e-5)
            attn_sum = attn_sum * inv_max
            attn_obj = attn_obj * inv_max
        # bg = 1 - seg  =>  sum(bg) = L - sum(seg); sum(attn*bg) = sum(attn) - sum(attn*seg)
        attn_bg = attn_sum - attn_obj
        bg_sum = (jnp.float32(n_cols) - seg_sum) + 1e-5
        obj_sum = seg_sum + 1e-5
        out_ref[...] = (attn_bg / bg_sum - attn_obj / obj_sum).astype(out_ref.dtype)


def balanced_l1_loss(object_token_attn_prob, object_segmaps,
                     threshold: float = 1.0, normalize: bool = False,
                     block_rows=None, block_cols=None):
    """Pallas TPU implementation of BalancedL1Loss.forward.

    object_token_attn_prob: (B, T, L) float (f32 or bf16)
    object_segmaps:         (B, T, L) 0/1 masks (f32 / bf16 / int8)
    returns:                (B, T) float32
    """
    del threshold  # unused in the reference forward pass
    B, T, L = object_token_attn_prob.shape
    assert object_segmaps.shape == (B, T, L)
    R = B * T

    # Sublane-dense layout: (B, T, L) -> (R, L); reduction axis L stays in lanes.
    attn2 = object_token_attn_prob.reshape(R, L)
    seg2 = object_segmaps.reshape(R, L)

    bytes_per_elem = attn2.dtype.itemsize + seg2.dtype.itemsize
    tr, tl = _choose_tiles(R, L, bytes_per_elem, block_rows, block_cols)
    grid = (pl.cdiv(R, tr), pl.cdiv(L, tl))

    kernel = functools.partial(_balanced_l1_kernel, normalize=normalize, n_cols=L)

    out = pl.pallas_call(
        kernel,
        out_shape=jax.ShapeDtypeStruct((R, 1), jnp.float32),
        grid=grid,
        in_specs=[
            pl.BlockSpec((tr, tl), lambda ri, li: (ri, li)),
            pl.BlockSpec((tr, tl), lambda ri, li: (ri, li)),
        ],
        # Same output block across the L axis: resident accumulator-output,
        # written once per row tile on the last L step.
        out_specs=pl.BlockSpec((tr, 1), lambda ri, li: (ri, 0)),
        scratch_shapes=[
            pltpu.VMEM((tr, 1), jnp.float32),   # sum(attn)
            pltpu.VMEM((tr, 1), jnp.float32),   # sum(seg)
            pltpu.VMEM((tr, 1), jnp.float32),   # sum(attn * seg)
            pltpu.VMEM((tr, 1), jnp.float32),   # max(attn)  (normalize only)
        ],
        compiler_params=pltpu.CompilerParams(
            dimension_semantics=("parallel", "arbitrary"),
            vmem_limit_bytes=_VMEM_LIMIT_BYTES,
        ),
    )(attn2, seg2)

    return out.reshape(B, T)


def _reference(attn, seg, normalize=False):
    attn = attn.astype(jnp.float32)
    seg = seg.astype(jnp.float32)
    if normalize:
        attn = attn / (jnp.max(attn, axis=2, keepdims=True) + 1e-5)
    bg = 1.0 - seg
    bg_sum = jnp.sum(bg, axis=2) + 1e-5
    obj_sum = jnp.sum(seg, axis=2) + 1e-5
    return jnp.sum(attn * bg, axis=2) / bg_sum - jnp.sum(attn * seg, axis=2) / obj_sum


if __name__ == "__main__":
    key = jax.random.PRNGKey(0)
    k1, k2, k3, k4 = jax.random.split(key, 4)

    # 1) realistic small case: 32x32 attention map, f32 (exercises chunked reduce).
    B, T, L = 2, 4, 1024
    attn = jax.nn.softmax(jax.random.normal(k1, (B, T, L), jnp.float32), axis=-1)
    seg = (jax.random.uniform(k2, (B, T, L)) > 0.5).astype(jnp.float32)
    out = jax.block_until_ready(balanced_l1_loss(attn, seg))
    ref = _reference(attn, seg)
    assert out.shape == (B, T)
    assert jnp.allclose(out, ref, atol=1e-5, rtol=1e-4), (out, ref)

    # 2) normalize=True (folded 1/(max+eps) path, exact divides).
    out_n = jax.block_until_ready(balanced_l1_loss(attn, seg, normalize=True))
    ref_n = _reference(attn, seg, normalize=True)
    assert jnp.allclose(out_n, ref_n, atol=1e-5, rtol=1e-4), (out_n, ref_n)

    # 3) reduced-bandwidth dtypes: bf16 attention + int8 segmaps (dtype-aware tiling).
    out_lp = jax.block_until_ready(
        balanced_l1_loss(attn.astype(jnp.bfloat16), seg.astype(jnp.int8)))
    ref_lp = _reference(attn.astype(jnp.bfloat16), seg.astype(jnp.int8))
    assert jnp.allclose(out_lp, ref_lp, atol=1e-4, rtol=1e-4), (out_lp, ref_lp)

    # 4) forced L-axis grid split with a ragged last block (masking + L accumulation).
    B2, T2, L2 = 1, 8, 1280
    attn_s = jax.nn.softmax(jax.random.normal(k3, (B2, T2, L2), jnp.float32), axis=-1)
    seg_s = (jax.random.uniform(k4, (B2, T2, L2)) > 0.5).astype(jnp.float32)
    out_s = jax.block_until_ready(
        balanced_l1_loss(attn_s, seg_s, normalize=True, block_cols=512))
    ref_s = _reference(attn_s, seg_s, normalize=True)
    assert jnp.allclose(out_s, ref_s, atol=1e-5, rtol=1e-4), (out_s, ref_s)

    # 5) multiple row tiles + multi-step L accumulation (full 2-D grid).
    B3, T3, L3 = 2, 96, 384
    attn_g = jax.nn.softmax(jax.random.normal(k1, (B3, T3, L3), jnp.float32), axis=-1)
    seg_g = (jax.random.uniform(k2, (B3, T3, L3)) > 0.5).astype(jnp.float32)
    out_g = jax.block_until_ready(balanced_l1_loss(attn_g, seg_g, block_cols=128))
    ref_g = _reference(attn_g, seg_g)
    assert jnp.allclose(out_g, ref_g, atol=1e-5, rtol=1e-4), (out_g, ref_g)

    print("KERNEL_OK")
</pallas_src>

<mosaic_0001>
module attributes {stable_mosaic.version = 11 : i64} {
  func.func @_balanced_l1_kernel(%arg0: i32, %arg1: i32, %arg2: memref<8x1024xf32, #tpu.memory_space<vmem>>, %arg3: memref<8x1024xf32, #tpu.memory_space<vmem>>, %arg4: memref<8x1xf32, #tpu.memory_space<vmem>>, %arg5: memref<8x1xf32, #tpu.memory_space<vmem>>, %arg6: memref<8x1xf32, #tpu.memory_space<vmem>>, %arg7: memref<8x1xf32, #tpu.memory_space<vmem>>, %arg8: memref<8x1xf32, #tpu.memory_space<vmem>>) attributes {dimension_semantics = [#tpu.dimension_semantics<parallel>, #tpu.dimension_semantics<arbitrary>], iteration_bounds = array<i64: 1, 1>, scalar_prefetch = 0 : i64, scratch_operands = 4 : i64, tpu.core_type = #tpu.core_type<tc>, window_params = [{transform_indices = @transform_0, window_bounds = array<i64: 8, 1024>}, {transform_indices = @transform_1, window_bounds = array<i64: 8, 1024>}, {transform_indices = @transform_2, window_bounds = array<i64: 8, 1>}]} {
    %c0_i32 = arith.constant 0 : i32
    %0 = arith.cmpi eq, %arg1, %c0_i32 : i32
    %1 = arith.extui %0 : i1 to i32
    %c0_i32_0 = arith.constant 0 : i32
    %2 = arith.cmpi ne, %1, %c0_i32_0 : i32
    scf.if %2 {
      %cst = arith.constant 0.000000e+00 : f32
      %7 = vector.broadcast %cst : f32 to vector<8x1xf32>
      %c0 = arith.constant 0 : index
      %c0_5 = arith.constant 0 : index
      %8 = vector.load %arg5[%c0, %c0_5] : memref<8x1xf32, #tpu.memory_space<vmem>>, vector<8x1xf32>
      tpu.vector_store %arg5[%c0, %c0_5], %7 {strides = array<i32>} : memref<8x1xf32, #tpu.memory_space<vmem>>, vector<8x1xf32>,
      %cst_6 = arith.constant 0.000000e+00 : f32
      %9 = vector.broadcast %cst_6 : f32 to vector<8x1xf32>
      %c0_7 = arith.constant 0 : index
      %c0_8 = arith.constant 0 : index
      %10 = vector.load %arg6[%c0_7, %c0_8] : memref<8x1xf32, #tpu.memory_space<vmem>>, vector<8x1xf32>
      tpu.vector_store %arg6[%c0_7, %c0_8], %9 {strides = array<i32>} : memref<8x1xf32, #tpu.memory_space<vmem>>, vector<8x1xf32>,
      %cst_9 = arith.constant 0.000000e+00 : f32
      %11 = vector.broadcast %cst_9 : f32 to vector<8x1xf32>
      %c0_10 = arith.constant 0 : index
      %c0_11 = arith.constant 0 : index
      %12 = vector.load %arg7[%c0_10, %c0_11] : memref<8x1xf32, #tpu.memory_space<vmem>>, vector<8x1xf32>
      tpu.vector_store %arg7[%c0_10, %c0_11], %11 {strides = array<i32>} : memref<8x1xf32, #tpu.memory_space<vmem>>, vector<8x1xf32>,
    } else {
    }
    %c0_i32_1 = arith.constant 0 : i32
    %c2_i32 = arith.constant 2 : i32
    %3 = arith.addi %c0_i32_1, %c2_i32 : i32
    %c1_i32 = arith.constant 1 : i32
    scf.for %arg9 = %c0_i32_1 to %3 step %c1_i32  : i32 {
      %c1_i32_5 = arith.constant 1 : i32
      %7 = arith.muli %arg9, %c1_i32_5 : i32
      %c0_i32_6 = arith.constant 0 : i32
      %8 = arith.addi %c0_i32_6, %7 : i32
      %c512_i32 = arith.constant 512 : i32
      %9 = arith.muli %8, %c512_i32 : i32
      %10 = tpu.assume_multiple %9, 512 : i32
      %c0 = arith.constant 0 : index
      %11 = arith.index_cast %10 : i32 to index
      %12 = vector.load %arg2[%c0, %11] : memref<8x1024xf32, #tpu.memory_space<vmem>>, vector<8x512xf32>
      %c0_7 = arith.constant 0 : index
      %13 = arith.index_cast %10 : i32 to index
      %14 = vector.load %arg3[%c0_7, %13] : memref<8x1024xf32, #tpu.memory_space<vmem>>, vector<8x512xf32>
      %c0_8 = arith.constant 0 : index
      %c0_9 = arith.constant 0 : index
      %15 = vector.load %arg5[%c0_8, %c0_9] : memref<8x1xf32, #tpu.memory_space<vmem>>, vector<8x1xf32>
      %cst = arith.constant dense<0.000000e+00> : vector<8xf32>
      %16 = vector.multi_reduction <add>, %12, %cst [1] : vector<8x512xf32> to vector<8xf32>
      %17 = vector.shape_cast %16 : vector<8xf32> to vector<8x1xf32>
      %18 = arith.addf %15, %17 : vector<8x1xf32>
      %c0_10 = arith.constant 0 : index
      %c0_11 = arith.constant 0 : index
      %19 = vector.load %arg5[%c0_10, %c0_11] : memref<8x1xf32, #tpu.memory_space<vmem>>, vector<8x1xf32>
      tpu.vector_store %arg5[%c0_10, %c0_11], %18 {strides = array<i32>} : memref<8x1xf32, #tpu.memory_space<vmem>>, vector<8x1xf32>,
      %c0_12 = arith.constant 0 : index
      %c0_13 = arith.constant 0 : index
      %20 = vector.load %arg6[%c0_12, %c0_13] : memref<8x1xf32, #tpu.memory_space<vmem>>, vector<8x1xf32>
      %cst_14 = arith.constant dense<0.000000e+00> : vector<8xf32>
      %21 = vector.multi_reduction <add>, %14, %cst_14 [1] : vector<8x512xf32> to vector<8xf32>
      %22 = vector.shape_cast %21 : vector<8xf32> to vector<8x1xf32>
      %23 = arith.addf %20, %22 : vector<8x1xf32>
      %c0_15 = arith.constant 0 : index
      %c0_16 = arith.constant 0 : index
      %24 = vector.load %arg6[%c0_15, %c0_16] : memref<8x1xf32, #tpu.memory_space<vmem>>, vector<8x1xf32>
      tpu.vector_store %arg6[%c0_15, %c0_16], %23 {strides = array<i32>} : memref<8x1xf32, #tpu.memory_space<vmem>>, vector<8x1xf32>,
      %c0_17 = arith.constant 0 : index
      %c0_18 = arith.constant 0 : index
      %25 = vector.load %arg7[%c0_17, %c0_18] : memref<8x1xf32, #tpu.memory_space<vmem>>, vector<8x1xf32>
      %26 = arith.mulf %12, %14 : vector<8x512xf32>
      %cst_19 = arith.constant dense<0.000000e+00> : vector<8xf32>
      %27 = vector.multi_reduction <add>, %26, %cst_19 [1] : vector<8x512xf32> to vector<8xf32>
      %28 = vector.shape_cast %27 : vector<8xf32> to vector<8x1xf32>
      %29 = arith.addf %25, %28 : vector<8x1xf32>
      %c0_20 = arith.constant 0 : index
      %c0_21 = arith.constant 0 : index
      %30 = vector.load %arg7[%c0_20, %c0_21] : memref<8x1xf32, #tpu.memory_space<vmem>>, vector<8x1xf32>
      tpu.vector_store %arg7[%c0_20, %c0_21], %29 {strides = array<i32>} : memref<8x1xf32, #tpu.memory_space<vmem>>, vector<8x1xf32>,
    }
    %c2_i32_2 = arith.constant 2 : i32
    %c0_i32_3 = arith.constant 0 : i32
    %4 = arith.cmpi eq, %arg1, %c0_i32_3 : i32
    %5 = arith.extui %4 : i1 to i32
    %c0_i32_4 = arith.constant 0 : i32
    %6 = arith.cmpi ne, %5, %c0_i32_4 : i32
    scf.if %6 {
      %c0 = arith.constant 0 : index
      %c0_5 = arith.constant 0 : index
      %7 = vector.load %arg5[%c0, %c0_5] : memref<8x1xf32, #tpu.memory_space<vmem>>, vector<8x1xf32>
      %c0_6 = arith.constant 0 : index
      %c0_7 = arith.constant 0 : index
      %8 = vector.load %arg7[%c0_6, %c0_7] : memref<8x1xf32, #tpu.memory_space<vmem>>, vector<8x1xf32>
      %c0_8 = arith.constant 0 : index
      %c0_9 = arith.constant 0 : index
      %9 = vector.load %arg6[%c0_8, %c0_9] : memref<8x1xf32, #tpu.memory_space<vmem>>, vector<8x1xf32>
      %10 = arith.subf %7, %8 : vector<8x1xf32>
      %cst = arith.constant 1.024000e+03 : f32
      %11 = vector.broadcast %cst : f32 to vector<8x1xf32>
      %12 = arith.subf %11, %9 : vector<8x1xf32>
      %cst_10 = arith.constant 9.99999974E-6 : f32
      %13 = vector.broadcast %cst_10 : f32 to vector<8x1xf32>
      %14 = arith.addf %12, %13 : vector<8x1xf32>
      %cst_11 = arith.constant 9.99999974E-6 : f32
      %15 = vector.broadcast %cst_11 : f32 to vector<8x1xf32>
      %16 = arith.addf %9, %15 : vector<8x1xf32>
      %17 = arith.divf %10, %14 : vector<8x1xf32>
      %18 = arith.divf %8, %16 : vector<8x1xf32>
      %19 = arith.subf %17, %18 : vector<8x1xf32>
      %c0_12 = arith.constant 0 : index
      %c0_13 = arith.constant 0 : index
      %20 = vector.load %arg4[%c0_12, %c0_13] : memref<8x1xf32, #tpu.memory_space<vmem>>, vector<8x1xf32>
      tpu.vector_store %arg4[%c0_12, %c0_13], %19 {strides = array<i32>} : memref<8x1xf32, #tpu.memory_space<vmem>>, vector<8x1xf32>,
    } else {
    }
    return
  }
  func.func @transform_0(%arg0: i32, %arg1: i32) -> (i32, i32) {
    %c0_i32 = arith.constant 0 : i32
    return %arg0, %arg1 : i32, i32
  }
  func.func @transform_1(%arg0: i32, %arg1: i32) -> (i32, i32) {
    %c0_i32 = arith.constant 0 : i32
    return %arg0, %arg1 : i32, i32
  }
  func.func @transform_2(%arg0: i32, %arg1: i32) -> (i32, i32) {
    %c0_i32 = arith.constant 0 : i32
    %c0_i32_0 = arith.constant 0 : i32
    return %arg0, %c0_i32 : i32, i32
  }
}

</mosaic_0001>

<bundles_post_ra>
// kernel: tpu_custom_call.1
= control target key start
LH: loop header
LB: loop body
LE: loop exit
PB: predicated region body
PF: predicated region fallthrough
CT: control target
= control target key end

     0   :  { %7 = vsyncpa [#allocation7], 0  ;;  %s260_s0 = inlined_call_operand.hbm [shape: f32[8,1024], index: 0, kind: input, shape index: {}]   ;;  %s261_s1 = inlined_call_operand.hbm [shape: f32[8,1024], index: 1, kind: input, shape index: {}]   ;;  %s262_s2 = inlined_call_operand.vmem [shape: f32[8,1], index: 2, kind: output, shape index: {}]  }
   0x1   :  { %8 = vsyncpa [#allocation9], 0  ;;  %s199_s9 = smov [#allocation6]   ;;  %s200_s11 = smov [#allocation8]  }
   0x2   :  { %s15_s10 = sshll.u32 %s199_s9, 4  ;;  %s25_s12 = sshll.u32 %s200_s11, 4  ;;  %s16_s10 = int_to_ptr.vmem [resolvable:$true] %s15_s10  ;;  %s26_s12 = int_to_ptr.vmem [resolvable:$true] %s25_s12 }
   0x3   :  { %s143_s15 = scalar_lea.hbm %s260_s0, 1024 }
   0x4   :  { %p144_p0 = scmp.ne.s32.totalorder %s260_s0, %s143_s15  ;;  %p147_p1 = scmp.lt.u32.totalorder %s143_s15, %s260_s0 }
   0x6   :  { %p149_p2 = pnand %p147_p1, %p144_p0 }
   0x8   :  { %152 = shalt.err (!%p149_p2)
}
   0x9   :  { %s153_s20 = scalar_lea.vmem %s16_s10, 1024  ;;  %p158_p4 = scmp.lt.s32.totalorder %s16_s10, %s16_s10 }
   0xa   :  { %p154_p3 = scmp.ne.s32.totalorder %s16_s10, %s153_s20  ;;  %p159_p5 = scmp.lt.s32.totalorder %s153_s20, %s153_s20 }
   0xc   :  { %p160_p6 = por %p159_p5, %p158_p4 }
   0xe   :  { %p161_p7 = pnand %p160_p6, %p154_p3 }
  0x10   :  { %164 = shalt.err (!%p161_p7)
}
  0x11   :  { %18 = dma.hbm_to_vmem [thread:$0]  %s260_s0, 1024, %s16_s10, [#allocation7]  }
  0x12   :  { %s165_s25 = scalar_lea.hbm %s261_s1, 1024 }
  0x13   :  { %p166_p8 = scmp.ne.s32.totalorder %s261_s1, %s165_s25  ;;  %p169_p9 = scmp.lt.u32.totalorder %s165_s25, %s261_s1 }
  0x15   :  { %p171_p10 = pnand %p169_p9, %p166_p8 }
  0x17   :  { %174 = shalt.err (!%p171_p10)
}
  0x18   :  { %s175_s30 = scalar_lea.vmem %s26_s12, 1024  ;;  %p180_p12 = scmp.lt.s32.totalorder %s26_s12, %s26_s12 }
  0x19   :  { %p176_p11 = scmp.ne.s32.totalorder %s26_s12, %s175_s30  ;;  %p181_p13 = scmp.lt.s32.totalorder %s175_s30, %s175_s30 }
  0x1b   :  { %p182_p0 = por %p181_p13, %p180_p12 }
  0x1d   :  { %p183_p1 = pnand %p182_p0, %p176_p11 }
  0x1f   :  { %186 = shalt.err (!%p183_p1)
}
  0x20   :  { %28 = dma.hbm_to_vmem [thread:$0]  %s261_s1, 1024, %s26_s12, [#allocation9]  }
  0x21   :  { %191 = dma.done.wait [#allocation7], 1024  }
  0x22   :  { %192 = vsyncadd [#allocation7], 4294966272 }
  0x23   :  { %193 = dma.done.wait [#allocation9], 1024  }
  0x24   :  { %194 = vsyncadd [#allocation9], 4294966272  ;;  %vm39_vm0 = vcmask 7168   ;;  %v201_v0 = vmov 0.0   ;;  %s244_s4 = smov 0  }
  0x25   :  { %40 = vst.msk [vmem:[#allocation2] sm:$0xff] %vm39_vm0, %v201_v0  ;;  %41 = vst.msk [vmem:[#allocation3] sm:$0xff] %vm39_vm0, %v201_v0 }
  0x26   :  { %42 = vst.msk [vmem:[#allocation4] sm:$0xff] %vm39_vm0, %v201_v0 }
  0x27 LB: > { %s125_s1 = sshll.u32 %s197_s4, 9  ;;  %s48_s4 = sadd.s32 1, %s197_s4   ;;  %s197_s4 = sphi %s244_s4, %s48_s4  }
  0x28   : > { %s50_s5 = sshra.s32 %s125_s1, 7  ;;  %p45_p2 = scmp.ge.s32.totalorder %s48_s4, 2  }
  0x29   : > { %s126_s6 = sshll.u32 %s50_s5, 3 }
  0x2a   : > { %s53_s7 = scalar_lea.vmem [#allocation6], %s126_s6  ;;  %s59_s8 = scalar_lea.vmem [#allocation8], %s126_s6 }
  0x2b   : > { %v54_v1 = vld [vmem:[%s53_s7] sm:$0xff]  ;;  %v55_v2 = vld [vmem:[%s53_s7 + $0x8] sm:$0xff]  ;;  %v56_v3 = vld [vmem:[%s53_s7 + $0x10] sm:$0xff] }
  0x2c   : > { %v65_v4 = vadd.f32 %v55_v2, %v54_v1  ;;  %v60_v5 = vld [vmem:[%s59_s8] sm:$0xff]  ;;  %v61_v6 = vld [vmem:[%s59_s8 + $0x8] sm:$0xff]  ;;  %v57_v7 = vld [vmem:[%s53_s7 + $0x18] sm:$0xff] }
  0x2d   : > { %v62_v8 = vld [vmem:[%s59_s8 + $0x10] sm:$0xff]  ;;  %v63_v9 = vld [vmem:[%s59_s8 + $0x18] sm:$0xff]  ;;  %v82_v10 = vmul.f32 %v60_v5, %v54_v1  ;;  %v83_v11 = vmul.f32 %v61_v6, %v55_v2  ;;  %v74_v12 = vadd.f32 %v61_v6, %v60_v5  ;;  %v64_v22 = vld [vmem:[#allocation2] sm:$0xff] }
  0x2e   : > { %v66_v13 = vadd.f32 %v65_v4, %v56_v3  ;;  %v84_v14 = vmul.f32 %v62_v8, %v56_v3  ;;  %v85_v15 = vmul.f32 %v63_v9, %v57_v7  ;;  %v81_v25 = vld [vmem:[#allocation4] sm:$0xff]  ;;  %v73_v26 = vld [vmem:[#allocation3] sm:$0xff] }
  0x2f   : > { %v86_v16 = vadd.f32 %v83_v11, %v82_v10  ;;  %v75_v17 = vadd.f32 %v74_v12, %v62_v8 }
  0x30   : > { %v67_v18 = vadd.f32 %v66_v13, %v57_v7 }
  0x31   : > { %v87_v19 = vadd.f32 %v86_v16, %v84_v14  ;;  %v76_v20 = vadd.f32 %v75_v17, %v63_v9 }
  0x32   : > { %68 = vadd.xlane.f32.xlu0 %v67_v18 }
  0x33   : > { %v88_v21 = vadd.f32 %v87_v19, %v85_v15 }
  0x35   : > { %89 = vadd.xlane.f32.xlu1 %v88_v21 }
  0x36   : > { %77 = vadd.xlane.f32.xlu0 %v76_v20 }
  0xbf   : > { %v69_v23 = vpop.xlane.xlu0 %68 }
  0xc0   : > { %v70_v24 = vadd.f32 %v69_v23, %v64_v22  ;;  %47 = sbr.rel (!%p45_p2) target bundleno = 39 (0x27), region = 53 }
  0xc2   : > { %72 = vst.msk [vmem:[#allocation2] sm:$0xff] %vm39_vm0, %v70_v24  ;;  %v90_v27 = vpop.xlane.xlu1 %89 }
  0xc3   : > { %v91_v28 = vadd.f32 %v90_v27, %v81_v25  ;;  %v78_v29 = vpop.xlane.xlu0 %77 }
  0xc4   : > { %v79_v30 = vadd.f32 %v78_v29, %v73_v26 }
  0xc5   : > { %92 = vst.msk [vmem:[#allocation4] sm:$0xff] %vm39_vm0, %v91_v28 }
  0xc6   : > { %80 = vst.msk [vmem:[#allocation3] sm:$0xff] %vm39_vm0, %v79_v30 }
  0xc9   :  { %v96_v35 = vld [vmem:[#allocation2] sm:$0xff] }
  0xcc   :  { %v97_v36 = vld [vmem:[#allocation4] sm:$0xff] }
  0xcd   :  { %v98_v31 = vld [vmem:[#allocation3] sm:$0xff]  ;;  %v99_v37 = vsub.f32 %v96_v35, %v97_v36 }
  0xce   :  { %v100_v32 = vsub.f32 1024.0, %v98_v31  ;;  %v102_v33 = vadd.f32 1e-05, %v98_v31 }
  0xd0   :  { %v101_v34 = vadd.f32 1e-05, %v100_v32  ;;  %139 = vrcp.f32 %v102_v33 }
  0xd2   :  { %141 = vrcp.f32 %v101_v34 }
  0xda   :  { %v140_v38 = vpop.eup %139 }
  0xdb   :  { %v106_v39 = vmul.f32 %v140_v38, %v97_v36 }
  0xdc   :  { %v142_v40 = vpop.eup %141 }
  0xdd   :  { %v104_v41 = vmul.f32 %v142_v40, %v99_v37 }
  0xdf   :  { %v107_v42 = vsub.f32 %v104_v41, %v106_v39 }
  0xe1   :  { %109 = vst.msk [vmem:[%s262_s2] sm:$0xff] %vm39_vm0, %v107_v42 }
  0xe2   :  { %114 = vsyncpa [#allocation7], 1 }
  0xe3   :  { %115 = vsyncpa [#allocation9], 1 }

</bundles_post_ra>
